<compile_context>
chip_gen: v7x
topology: tpu7x:2x2x1
jax: 0.10.0
libtpu: 0.0.40
codegen_flags: <defaults>
</compile_context>

<pallas_src>
import jax
import jax.numpy as jnp
from jax import lax
from jax.experimental import pallas as pl
from jax.experimental.pallas import tpu as pltpu

_EPS = 1e-5  # nn.LayerNorm default

# Per-buffer tiles are capped at ~2 MiB so double-buffered input + output
# (4 resident tiles) stays well under the scoped-VMEM limit on every
# generation (v5e 16 MiB default, v6e 32 MiB, v7x 32 MiB scoped / 64 MiB phys).
_PER_TILE_BUDGET = 2 * 1024 * 1024
# Amortize the ~0.35 us per-grid-step overhead on small shapes.
_MIN_TILE_TARGET = 512 * 1024


def _norm_kernel(x_ref, g_ref, b_ref, o_ref):
    """Channel LayerNorm on a (BN, C, TL) tile.

    x_ref / o_ref : (BN, C, TL)
    g_ref / b_ref : (C, 1) affine params, broadcast along L
    Statistics are per (batch, l) position over the channel axis (axis=1).
    """
    x = x_ref[...].astype(jnp.float32)                           # (BN, C, TL)
    mean = jnp.mean(x, axis=1, keepdims=True)                    # (BN, 1, TL)
    centered = x - mean
    var = jnp.mean(centered * centered, axis=1, keepdims=True)   # biased var
    inv_std = lax.rsqrt(var + _EPS)
    y = centered * inv_std * g_ref[...] + b_ref[...]             # (C,1) bcast
    o_ref[...] = y.astype(o_ref.dtype)


def _choose_tiles(n, c, l, itemsize):
    """Pick (BN, TL): TL lane-dense (multiple of 128), tiles ~0.5-2 MiB."""
    # Largest lane tile keeping a single buffer under the budget.
    max_tl = max(128, (_PER_TILE_BUDGET // max(c * itemsize, 1)) // 128 * 128)
    l_pad128 = pl.cdiv(l, 128) * 128
    tl = min(max_tl, l_pad128)

    # If a single-batch tile is tiny, block several batch elements per grid
    # step so the kernel stays HBM-bound rather than step-overhead-bound.
    tile_bytes = c * tl * itemsize
    bn = 1
    if n > 1 and tile_bytes < _MIN_TILE_TARGET:
        want = max(1, _MIN_TILE_TARGET // tile_bytes)
        for d in range(min(n, want), 0, -1):
            if n % d == 0 and d * tile_bytes <= _PER_TILE_BUDGET:
                bn = d
                break
    return bn, tl


def norm_ncl(x, gamma, beta):
    """LayerNorm over the channel axis of an (N, C, L) tensor.

    Equivalent to Norm.forward: transpose(1,2) -> LayerNorm(C) -> transpose
    back, fused into one pass (no transposes materialized).

    x:     (N, C, L)
    gamma: (C,)  LayerNorm weight
    beta:  (C,)  LayerNorm bias
    returns (N, C, L)
    """
    n, c, l = x.shape
    itemsize = jnp.dtype(x.dtype).itemsize
    bn, tl = _choose_tiles(n, c, l, itemsize)

    # Pad L so every tile is full and lane-dense (multiple of 128 lanes).
    # Per-(n, l) statistics are independent along L, so padded columns just
    # produce junk that is sliced off afterwards — never a masked vst path.
    l_pad = pl.cdiv(l, tl) * tl
    x_p = x if l_pad == l else jnp.pad(x, ((0, 0), (0, 0), (0, l_pad - l)))

    g2 = gamma.reshape(c, 1).astype(jnp.float32)
    b2 = beta.reshape(c, 1).astype(jnp.float32)

    grid = (n // bn, l_pad // tl)

    out = pl.pallas_call(
        _norm_kernel,
        out_shape=jax.ShapeDtypeStruct((n, c, l_pad), x.dtype),
        grid_spec=pltpu.PrefetchScalarGridSpec(
            num_scalar_prefetch=0,
            grid=grid,
            in_specs=[
                # NOTE: for DMA-latency-bound shapes, pipeline_mode=pl.Buffered(3)
                # on this spec is a knob worth sweeping; kept at the default
                # depth 2 to stay inside the v7x VMEM budget.
                pl.BlockSpec((bn, c, tl), lambda i, j: (i, 0, j)),
                pl.BlockSpec((c, 1), lambda i, j: (0, 0)),   # gamma (resident)
                pl.BlockSpec((c, 1), lambda i, j: (0, 0)),   # beta  (resident)
            ],
            out_specs=pl.BlockSpec((bn, c, tl), lambda i, j: (i, 0, j)),
        ),
        compiler_params=pltpu.CompilerParams(
            # Every (batch-block, l-tile) is independent: no cross-step
            # reduction, so both axes are megacore / dual-TC shardable.
            dimension_semantics=("parallel", "parallel"),
            # Raise v5e's 16 MiB scoped default; equals the v6e/v7x default.
            vmem_limit_bytes=32 * 1024 * 1024,
        ),
    )(x_p, g2, b2)

    return out if l_pad == l else out[:, :, :l]


def _reference(x, gamma, beta):
    # Pure-JAX reference mirroring the PyTorch module:
    # transpose -> LayerNorm(last dim) -> transpose back.
    xt = jnp.transpose(x, (0, 2, 1)).astype(jnp.float32)   # (N, L, C)
    mean = jnp.mean(xt, axis=-1, keepdims=True)
    var = jnp.mean((xt - mean) ** 2, axis=-1, keepdims=True)
    y = (xt - mean) / jnp.sqrt(var + _EPS)
    y = y * gamma + beta
    return jnp.transpose(y, (0, 2, 1)).astype(x.dtype)


if __name__ == "__main__":
    key = jax.random.PRNGKey(0)

    shapes = [
        (2, 32, 64),    # tiny: exercises L padding (64 -> 128) + batch blocking
        (3, 24, 384),   # non-pow2 C, 128-aligned L
        (2, 32, 200),   # ragged L (padded 200 -> 256, sliced back)
    ]
    for (N, C, L) in shapes:
        key, kx, kg, kb = jax.random.split(key, 4)
        x = jax.random.normal(kx, (N, C, L), dtype=jnp.float32)
        # nn.LayerNorm default init is weight=1, bias=0; perturb so the
        # affine path is actually exercised.
        gamma = 1.0 + 0.1 * jax.random.normal(kg, (C,), dtype=jnp.float32)
        beta = 0.1 * jax.random.normal(kb, (C,), dtype=jnp.float32)

        out = jax.block_until_ready(norm_ncl(x, gamma, beta))
        ref = _reference(x, gamma, beta)
        assert out.shape == (N, C, L)
        assert jnp.allclose(out, ref, atol=1e-5, rtol=1e-5), \
            f"mismatch vs reference at shape {(N, C, L)}"

    print("KERNEL_OK")
</pallas_src>

<mosaic_0001>
module attributes {stable_mosaic.version = 11 : i64} {
  func.func @_norm_kernel(%arg0: i32, %arg1: i32, %arg2: memref<2x32x128xf32, #tpu.memory_space<vmem>>, %arg3: memref<32x1xf32, #tpu.memory_space<vmem>>, %arg4: memref<32x1xf32, #tpu.memory_space<vmem>>, %arg5: memref<2x32x128xf32, #tpu.memory_space<vmem>>) attributes {dimension_semantics = [#tpu.dimension_semantics<parallel>, #tpu.dimension_semantics<parallel>], iteration_bounds = array<i64: 1, 1>, scalar_prefetch = 0 : i64, scratch_operands = 0 : i64, tpu.core_type = #tpu.core_type<tc>, window_params = [{transform_indices = @transform_0, window_bounds = array<i64: 2, 32, 128>}, {pipeline_mode = #tpu.pipeline_mode<synchronous>, transform_indices = @transform_1, window_bounds = array<i64: 32, 1>}, {pipeline_mode = #tpu.pipeline_mode<synchronous>, transform_indices = @transform_2, window_bounds = array<i64: 32, 1>}, {transform_indices = @transform_3, window_bounds = array<i64: 2, 32, 128>}]} {
    %c0 = arith.constant 0 : index
    %c0_0 = arith.constant 0 : index
    %c0_1 = arith.constant 0 : index
    %0 = vector.load %arg2[%c0, %c0_0, %c0_1] : memref<2x32x128xf32, #tpu.memory_space<vmem>>, vector<2x32x128xf32>
    %cst = arith.constant dense<0.000000e+00> : vector<2x128xf32>
    %1 = vector.multi_reduction <add>, %0, %cst [1] : vector<2x32x128xf32> to vector<2x128xf32>
    %2 = vector.shape_cast %1 : vector<2x128xf32> to vector<2x1x128xf32>
    %cst_2 = arith.constant 3.200000e+01 : f32
    %3 = vector.broadcast %cst_2 : f32 to vector<2x1x128xf32>
    %4 = arith.divf %2, %3 : vector<2x1x128xf32>
    %5 = vector.broadcast %4 : vector<2x1x128xf32> to vector<2x32x128xf32>
    %6 = arith.subf %0, %5 : vector<2x32x128xf32>
    %7 = arith.mulf %6, %6 : vector<2x32x128xf32>
    %cst_3 = arith.constant dense<0.000000e+00> : vector<2x128xf32>
    %8 = vector.multi_reduction <add>, %7, %cst_3 [1] : vector<2x32x128xf32> to vector<2x128xf32>
    %9 = vector.shape_cast %8 : vector<2x128xf32> to vector<2x1x128xf32>
    %cst_4 = arith.constant 3.200000e+01 : f32
    %10 = vector.broadcast %cst_4 : f32 to vector<2x1x128xf32>
    %11 = arith.divf %9, %10 : vector<2x1x128xf32>
    %cst_5 = arith.constant 9.99999974E-6 : f32
    %12 = vector.broadcast %cst_5 : f32 to vector<2x1x128xf32>
    %13 = arith.addf %11, %12 : vector<2x1x128xf32>
    %14 = math.rsqrt %13 : vector<2x1x128xf32>
    %15 = vector.broadcast %14 : vector<2x1x128xf32> to vector<2x32x128xf32>
    %16 = arith.mulf %6, %15 : vector<2x32x128xf32>
    %c0_6 = arith.constant 0 : index
    %c0_7 = arith.constant 0 : index
    %17 = vector.load %arg3[%c0_6, %c0_7] : memref<32x1xf32, #tpu.memory_space<vmem>>, vector<32x1xf32>
    %18 = vector.shape_cast %17 : vector<32x1xf32> to vector<1x32x1xf32>
    %19 = vector.broadcast %18 : vector<1x32x1xf32> to vector<2x32x128xf32>
    %20 = arith.mulf %16, %19 : vector<2x32x128xf32>
    %c0_8 = arith.constant 0 : index
    %c0_9 = arith.constant 0 : index
    %21 = vector.load %arg4[%c0_8, %c0_9] : memref<32x1xf32, #tpu.memory_space<vmem>>, vector<32x1xf32>
    %22 = vector.shape_cast %21 : vector<32x1xf32> to vector<1x32x1xf32>
    %23 = vector.broadcast %22 : vector<1x32x1xf32> to vector<2x32x128xf32>
    %24 = arith.addf %20, %23 : vector<2x32x128xf32>
    %c0_10 = arith.constant 0 : index
    %c0_11 = arith.constant 0 : index
    %c0_12 = arith.constant 0 : index
    %25 = vector.load %arg5[%c0_10, %c0_11, %c0_12] : memref<2x32x128xf32, #tpu.memory_space<vmem>>, vector<2x32x128xf32>
    tpu.vector_store %arg5[%c0_10, %c0_11, %c0_12], %24 {strides = array<i32>} : memref<2x32x128xf32, #tpu.memory_space<vmem>>, vector<2x32x128xf32>,
    return
  }
  func.func @transform_0(%arg0: i32, %arg1: i32) -> (i32, i32, i32) {
    %c0_i32 = arith.constant 0 : i32
    %c0_i32_0 = arith.constant 0 : i32
    return %arg0, %c0_i32, %arg1 : i32, i32, i32
  }
  func.func @transform_1(%arg0: i32, %arg1: i32) -> (i32, i32) {
    %c0_i32 = arith.constant 0 : i32
    %c0_i32_0 = arith.constant 0 : i32
    %c0_i32_1 = arith.constant 0 : i32
    return %c0_i32, %c0_i32_0 : i32, i32
  }
  func.func @transform_2(%arg0: i32, %arg1: i32) -> (i32, i32) {
    %c0_i32 = arith.constant 0 : i32
    %c0_i32_0 = arith.constant 0 : i32
    %c0_i32_1 = arith.constant 0 : i32
    return %c0_i32, %c0_i32_0 : i32, i32
  }
  func.func @transform_3(%arg0: i32, %arg1: i32) -> (i32, i32, i32) {
    %c0_i32 = arith.constant 0 : i32
    %c0_i32_0 = arith.constant 0 : i32
    return %arg0, %c0_i32, %arg1 : i32, i32, i32
  }
}

</mosaic_0001>

<bundles_post_ra>
// kernel: tpu_custom_call.1
= control target key start
LH: loop header
LB: loop body
LE: loop exit
PB: predicated region body
PF: predicated region fallthrough
CT: control target
= control target key end

     0   :  { %v214_v2 = vmov 0   ;;  %s298_s0 = inlined_call_operand.vmem [shape: f32[2,32,128], index: 0, kind: input, shape index: {}]   ;;  %s299_s1 = inlined_call_operand.vmem [shape: f32[32,1], index: 1, kind: input, shape index: {}]   ;;  %s300_s2 = inlined_call_operand.vmem [shape: f32[32,1], index: 2, kind: input, shape index: {}]   ;;  %s301_s3 = inlined_call_operand.hbm [shape: f32[2,32,128], index: 3, kind: output, shape index: {}]  }
   0x1   :  { %v94_v0 = vld [vmem:[%s299_s1 + $0x10] sm:$0xff]  ;;  %v92_v1 = vld [vmem:[%s299_s1] sm:$0xff]  ;;  %185 = vset.pattern.permute.xlu1 %v214_v2  ;;  %184 = vset.pattern.permute.xlu0 %v214_v2  ;;  %v95_v3 = vld [vmem:[%s299_s1 + $0x18] sm:$0xff] }
   0x2   :  { %108 = vperm.xlu1 %185, %v94_v0   ;;  %98 = vperm.xlu0 %184, %v92_v1   ;;  %v93_v4 = vld [vmem:[%s299_s1 + $0x8] sm:$0xff] }
   0x3   :  { %8 = vsyncpa [#allocation3], 0  ;;  %v125_v5 = vld [vmem:[%s300_s2 + $0x8] sm:$0xff]  ;;  %v124_v6 = vld [vmem:[%s300_s2] sm:$0xff] }
   0x4   :  { %v127_v7 = vld [vmem:[%s300_s2 + $0x18] sm:$0xff]  ;;  %v126_v8 = vld [vmem:[%s300_s2 + $0x10] sm:$0xff]  ;;  %v15_v9 = vld [vmem:[%s298_s0] sm:$0xff] }
   0x5   :  { %v16_v10 = vld [vmem:[%s298_s0 + $0x8] sm:$0xff]  ;;  %v19_v11 = vld [vmem:[%s298_s0 + $0x20] sm:$0xff]  ;;  %v17_v14 = vld [vmem:[%s298_s0 + $0x10] sm:$0xff] }
   0x6   :  { %113 = vperm.xlu1 %185, %v95_v3   ;;  %103 = vperm.xlu0 %184, %v93_v4   ;;  %v20_v12 = vld [vmem:[%s298_s0 + $0x28] sm:$0xff]  ;;  %v23_v13 = vadd.f32 %v16_v10, %v15_v9  ;;  %v21_v16 = vld [vmem:[%s298_s0 + $0x30] sm:$0xff]  ;;  %v18_v18 = vld [vmem:[%s298_s0 + $0x18] sm:$0xff] }
   0x7   :  { %v32_v15 = vadd.f32 %v20_v12, %v19_v11  ;;  %v22_v20 = vld [vmem:[%s298_s0 + $0x38] sm:$0xff]  ;;  %s215_s0 = smov [#allocation2]  }
   0x8   :  { %v24_v17 = vadd.f32 %v23_v13, %v17_v14  ;;  %s169_s15 = sshll.u32 %s215_s0, 4  ;;  %s170_s15 = int_to_ptr.vmem [resolvable:$true] %s169_s15 }
   0x9   :  { %v33_v19 = vadd.f32 %v32_v15, %v21_v16  ;;  %s190_s16 = scalar_lea.vmem %s170_s15, 1024  ;;  %p195_p1 = scmp.lt.s32.totalorder %s170_s15, %s170_s15 }
   0xa   :  { %135 = vperm.xlu1 %185, %v125_v5   ;;  %130 = vperm.xlu0 %184, %v124_v6   ;;  %v25_v21 = vadd.f32 %v24_v17, %v18_v18  ;;  %p191_p0 = scmp.ne.s32.totalorder %s170_s15, %s190_s16  ;;  %p196_p2 = scmp.lt.s32.totalorder %s190_s16, %s190_s16 }
   0xb   :  { %v34_v22 = vadd.f32 %v33_v19, %v22_v20 }
   0xc   :  { %v26_v23 = vrot.slane %v25_v21, 4  ;;  %p197_p3 = por %p196_p2, %p195_p1 }
   0xd   :  { %v35_v24 = vrot.slane %v34_v22, 4 }
   0xe   :  { %145 = vperm.xlu1 %185, %v127_v7   ;;  %140 = vperm.xlu0 %184, %v126_v8   ;;  %v27_v25 = vadd.f32 %v26_v23, %v25_v21  ;;  %p198_p4 = pnand %p197_p3, %p191_p0 }
   0xf   :  { %v36_v26 = vadd.f32 %v35_v24, %v34_v22 }
  0x10   :  { %v28_v27 = vrot.slane %v27_v25, 2 }
  0x11   :  { %v37_v28 = vrot.slane %v36_v26, 2 }
  0x12   :  { %v29_v29 = vadd.f32 %v28_v27, %v27_v25 }
  0x13   :  { %v38_v30 = vadd.f32 %v37_v28, %v36_v26 }
  0x14   :  { %v30_v31 = vrot.slane %v29_v29, 1 }
  0x15   :  { %v39_v32 = vrot.slane %v38_v30, 1 }
  0x16   :  { %v31_v33 = vadd.f32 %v30_v31, %v29_v29 }
  0x17   :  { %v40_v34 = vadd.f32 %v39_v32, %v38_v30 }
  0x18   :  { %v42_v35 = vmul.f32 0.03125, %v31_v33 }
  0x19   :  { %v43_v36 = vmul.f32 0.03125, %v40_v34 }
  0x1a   :  { %v44_v37 = vsub.f32 %v15_v9, %v42_v35  ;;  %v45_v38 = vsub.f32 %v16_v10, %v42_v35  ;;  %v46_v41 = vsub.f32 %v17_v14, %v42_v35  ;;  %v47_v47 = vsub.f32 %v18_v18, %v42_v35 }
  0x1b   :  { %v48_v39 = vsub.f32 %v19_v11, %v43_v36  ;;  %v49_v40 = vsub.f32 %v20_v12, %v43_v36  ;;  %v50_v44 = vsub.f32 %v21_v16, %v43_v36  ;;  %v51_v50 = vsub.f32 %v22_v20, %v43_v36 }
  0x1c   :  { %v52_v42 = vmul.f32 %v44_v37, %v44_v37  ;;  %v53_v43 = vmul.f32 %v45_v38, %v45_v38  ;;  %v54_v48 = vmul.f32 %v46_v41, %v46_v41  ;;  %v55_v53 = vmul.f32 %v47_v47, %v47_v47 }
  0x1d   :  { %v56_v45 = vmul.f32 %v48_v39, %v48_v39  ;;  %v57_v46 = vmul.f32 %v49_v40, %v49_v40  ;;  %v58_v51 = vmul.f32 %v50_v44, %v50_v44  ;;  %v59_v55 = vmul.f32 %v51_v50, %v51_v50 }
  0x1e   :  { %v60_v49 = vadd.f32 %v53_v43, %v52_v42 }
  0x1f   :  { %v69_v52 = vadd.f32 %v57_v46, %v56_v45 }
  0x20   :  { %v61_v54 = vadd.f32 %v60_v49, %v54_v48 }
  0x21   :  { %v70_v56 = vadd.f32 %v69_v52, %v58_v51 }
  0x22   :  { %v62_v57 = vadd.f32 %v61_v54, %v55_v53 }
  0x23   :  { %v71_v58 = vadd.f32 %v70_v56, %v59_v55 }
  0x24   :  { %v63_v59 = vrot.slane %v62_v57, 4 }
  0x25   :  { %v72_v60 = vrot.slane %v71_v58, 4 }
  0x26   :  { %v64_v61 = vadd.f32 %v63_v59, %v62_v57 }
  0x27   :  { %v73_v62 = vadd.f32 %v72_v60, %v71_v58 }
  0x28   :  { %v65_v63 = vrot.slane %v64_v61, 2 }
  0x29   :  { %v74_v0 = vrot.slane %v73_v62, 2 }
  0x2a   :  { %v66_v1 = vadd.f32 %v65_v63, %v64_v61 }
  0x2b   :  { %v75_v2 = vadd.f32 %v74_v0, %v73_v62 }
  0x2c   :  { %v67_v3 = vrot.slane %v66_v1, 1 }
  0x2d   :  { %v76_v4 = vrot.slane %v75_v2, 1 }
  0x2e   :  { %v68_v5 = vadd.f32 %v67_v3, %v66_v1 }
  0x2f   :  { %v77_v6 = vadd.f32 %v76_v4, %v75_v2 }
  0x30   :  { %v78_v7 = vmul.f32 0.03125, %v68_v5 }
  0x31   :  { %v79_v8 = vmul.f32 0.03125, %v77_v6 }
  0x32   :  { %v80_v9 = vadd.f32 1e-05, %v78_v7 }
  0x33   :  { %v81_v10 = vadd.f32 1e-05, %v79_v8 }
  0x34   :  { %186 = vrsqrt.f32 %v80_v9 }
  0x35   :  { %188 = vrsqrt.f32 %v81_v10 }
  0x3e   :  { %v187_v11 = vpop.eup %186 }
  0x3f   :  { %v189_v12 = vpop.eup %188  ;;  %v84_v15 = vmul.f32 %v187_v11, %v44_v37  ;;  %v85_v17 = vmul.f32 %v187_v11, %v45_v38  ;;  %v86_v21 = vmul.f32 %v187_v11, %v46_v41  ;;  %v87_v23 = vmul.f32 %v187_v11, %v47_v47 }
  0x40   :  { %v88_v16 = vmul.f32 %v189_v12, %v48_v39  ;;  %v89_v18 = vmul.f32 %v189_v12, %v49_v40  ;;  %v90_v22 = vmul.f32 %v189_v12, %v50_v44  ;;  %v91_v24 = vmul.f32 %v189_v12, %v51_v50 }
  0x81   :  { %v109_v13 = vpop.permute.xlu1 %108  ;;  %v99_v14 = vpop.permute.xlu0 %98 }
  0x82   :  { %v116_v25 = vmul.f32 %v99_v14, %v84_v15  ;;  %v120_v26 = vmul.f32 %v99_v14, %v88_v16  ;;  %v118_v35 = vmul.f32 %v109_v13, %v86_v21  ;;  %v122_v36 = vmul.f32 %v109_v13, %v90_v22 }
  0x85   :  { %v114_v19 = vpop.permute.xlu1 %113  ;;  %v104_v20 = vpop.permute.xlu0 %103 }
  0x86   :  { %v117_v27 = vmul.f32 %v104_v20, %v85_v17  ;;  %v121_v28 = vmul.f32 %v104_v20, %v89_v18  ;;  %v119_v37 = vmul.f32 %v114_v19, %v87_v23  ;;  %v123_v38 = vmul.f32 %v114_v19, %v91_v24 }
  0x89   :  { %v136_v29 = vpop.permute.xlu1 %135  ;;  %v131_v30 = vpop.permute.xlu0 %130 }
  0x8a   :  { %v149_v31 = vadd.f32 %v136_v29, %v117_v27  ;;  %v153_v32 = vadd.f32 %v136_v29, %v121_v28  ;;  %v148_v33 = vadd.f32 %v131_v30, %v116_v25  ;;  %v152_v34 = vadd.f32 %v131_v30, %v120_v26 }
  0x8c   :  { %157 = vst [vmem:[#allocation2 + $0x8] sm:$0xff] %v149_v31  ;;  %161 = vst [vmem:[#allocation2 + $0x28] sm:$0xff] %v153_v32 }
  0x8d   :  { %156 = vst [vmem:[#allocation2] sm:$0xff] %v148_v33  ;;  %160 = vst [vmem:[#allocation2 + $0x20] sm:$0xff] %v152_v34  ;;  %v146_v39 = vpop.permute.xlu1 %145  ;;  %v141_v40 = vpop.permute.xlu0 %140 }
  0x8e   :  { %v151_v41 = vadd.f32 %v146_v39, %v119_v37  ;;  %v155_v42 = vadd.f32 %v146_v39, %v123_v38  ;;  %v150_v43 = vadd.f32 %v141_v40, %v118_v35  ;;  %v154_v44 = vadd.f32 %v141_v40, %v122_v36 }
  0x90   :  { %159 = vst [vmem:[#allocation2 + $0x18] sm:$0xff] %v151_v41  ;;  %163 = vst [vmem:[#allocation2 + $0x38] sm:$0xff] %v155_v42 }
  0x91   :  { %158 = vst [vmem:[#allocation2 + $0x10] sm:$0xff] %v150_v43  ;;  %162 = vst [vmem:[#allocation2 + $0x30] sm:$0xff] %v154_v44 }
  0x92   :  { %201 = shalt.err (!%p198_p4)
}
  0x93   :  { %s202_s19 = scalar_lea.hbm %s301_s3, 1024 }
  0x94   :  { %p203_p5 = scmp.ne.s32.totalorder %s301_s3, %s202_s19  ;;  %p206_p6 = scmp.lt.u32.totalorder %s202_s19, %s301_s3 }
  0x96   :  { %p208_p7 = pnand %p206_p6, %p203_p5 }
  0x98   :  { %211 = shalt.err (!%p208_p7)
}
  0x99   :  { %s216_s24 = smov 128   ;;  %s217_s25 = smov 8  }
  0x9a   :  { %175 = dma.vmem_to_hbm [thread:$0]  %s170_s15, 1024, %s301_s3, [#allocation3], %s216_s24, %s216_s24, %s217_s25  }
  0x9b   :  { %212 = dma.done.wait [#allocation3], 1024  }
  0x9c   :  { %213 = vsyncadd [#allocation3], 4294966272 }
  0x9d   :  { %179 = vsyncpa [#allocation3], 1 }

</bundles_post_ra>
